<compile_context>
chip_gen: v5e
topology: v5e:2x2
jax: 0.10.0
libtpu: 0.0.40
codegen_flags: <defaults>
</compile_context>

<pallas_src>
import math
import functools

import jax
import jax.numpy as jnp
from jax import lax
from jax.experimental import pallas as pl
from jax.experimental.pallas import tpu as pltpu


_DN = (((1,), (1,)), ((), ()))   # contract last dim of x with last dim of W(out,in)


# ----------------------------- Pallas kernels ------------------------------

def _noisy_linear_train_kernel(x_ref, wmu_ref, wsig_ref, ein_ref, eout_ref,
                               bias_ref, o_ref):
    k = pl.program_id(1)

    @pl.when(k == 0)
    def _init():
        o_ref[...] = jnp.zeros_like(o_ref)

    x = x_ref[...]                              # (B, TK)
    xn = x * ein_ref[...]                       # (B, TK) * (1, TK) — tiny VPU pass

    # Mean path: x @ Wmu^T  (MXU eats the (out, in) layout directly, no transpose)
    mu_part = lax.dot_general(x, wmu_ref[...], _DN,
                              preferred_element_type=jnp.float32)
    # Noise path: eps_out ⊙ ((x ⊙ eps_in) @ Wsig^T)
    sig_part = lax.dot_general(xn, wsig_ref[...], _DN,
                               preferred_element_type=jnp.float32)

    o_ref[...] += mu_part + eout_ref[...] * sig_part

    @pl.when(k == pl.num_programs(1) - 1)
    def _finalize():
        o_ref[...] += bias_ref[...]             # bias pre-combined on host


def _noisy_linear_eval_kernel(x_ref, wmu_ref, bias_ref, o_ref):
    k = pl.program_id(1)

    @pl.when(k == 0)
    def _init():
        o_ref[...] = jnp.zeros_like(o_ref)

    o_ref[...] += lax.dot_general(x_ref[...], wmu_ref[...], _DN,
                                  preferred_element_type=jnp.float32)

    @pl.when(k == pl.num_programs(1) - 1)
    def _finalize():
        o_ref[...] += bias_ref[...]


# ------------------------------ host wrapper -------------------------------

def _pick_tile(dim, target):
    """Largest tile <= target that divides dim and is lane-legal
    (multiple of 128, or the full dim)."""
    t = min(target, dim)
    if t >= dim:
        return dim
    t = (t // 128) * 128
    while t >= 128:
        if dim % t == 0:
            return t
        t -= 128
    return dim


@functools.partial(jax.jit, static_argnames=("training", "tn", "tk"))
def noisy_linear(x, params, training=True, tn=512, tk=512):
    """x: (B, in_features) f32. params: dict from init_noisy_linear."""
    B, in_f = x.shape
    out_f = params["weight_mu"].shape[0]

    tn = _pick_tile(out_f, tn)
    tk = _pick_tile(in_f, tk)
    # Keep the parallel (out) grid axis >= 2 when possible so v7x's two
    # TensorCores both get work (near-zero impact on v5e/v6e, single TC).
    if out_f // tn < 2:
        half = out_f // 2
        if half >= 128 and half % 128 == 0:
            tn = _pick_tile(out_f, half)

    grid = (out_f // tn, in_f // tk)   # (parallel out-tiles, arbitrary K-tiles)

    x_spec = pl.BlockSpec((B, tk), lambda n, k: (0, k))
    w_spec = pl.BlockSpec((tn, tk), lambda n, k: (n, k))
    row_in_spec = pl.BlockSpec((1, tk), lambda n, k: (0, k))
    row_out_spec = pl.BlockSpec((1, tn), lambda n, k: (0, n))
    out_spec = pl.BlockSpec((B, tn), lambda n, k: (0, n))

    if training:
        bias = params["bias_mu"] + params["bias_sigma"] * params["bias_epsilon"]
        kernel = _noisy_linear_train_kernel
        args = (x, params["weight_mu"], params["weight_sigma"],
                params["eps_in_row"], params["eps_out_row"], bias)
        in_specs = [x_spec, w_spec, w_spec, row_in_spec, row_out_spec,
                    row_out_spec]
        n_weight_streams = 2
    else:
        kernel = _noisy_linear_eval_kernel
        args = (x, params["weight_mu"], params["bias_mu"])
        in_specs = [x_spec, w_spec, row_out_spec]
        n_weight_streams = 1

    # Rough double-buffered footprint (f32): weight streams dominate.
    est_bytes = 4 * 2 * (n_weight_streams * tn * tk      # weight tiles
                         + B * tk + B * tn               # x block + out block
                         + 8 * tk + 2 * 8 * tn)          # padded row operands
    vmem_limit = min(max(int(est_bytes * 1.5) + (1 << 20), 32 << 20), 64 << 20)

    return pl.pallas_call(
        kernel,
        out_shape=jax.ShapeDtypeStruct((B, out_f), jnp.float32),
        grid=grid,
        in_specs=in_specs,
        out_specs=out_spec,
        compiler_params=pltpu.CompilerParams(
            dimension_semantics=("parallel", "arbitrary"),
            vmem_limit_bytes=vmem_limit),
    )(*args)


# --------------------------- parameter construction ------------------------

def _scale_noise(key, size):
    # torch: x = randn(size); return x.sign() * x.abs().sqrt()
    x = jax.random.normal(key, (size,), dtype=jnp.float32)
    return jnp.sign(x) * jnp.sqrt(jnp.abs(x))


def init_noisy_linear(key, in_features, out_features, sigma_init=0.5):
    """Re-implementation of NoisyLinear.__init__ (reset_parameters + reset_noise)
    with jax.random. The factorized noise is kept as (1, n) rows; the full
    (out, in) epsilon outer product never exists."""
    k_wmu, k_bmu, k_ein, k_eout = jax.random.split(key, 4)
    mu_range = 1.0 / math.sqrt(in_features)

    weight_mu = jax.random.uniform(
        k_wmu, (out_features, in_features), jnp.float32, -mu_range, mu_range)
    weight_sigma = jnp.full((out_features, in_features),
                            sigma_init / math.sqrt(in_features), jnp.float32)
    bias_mu = jax.random.uniform(
        k_bmu, (1, out_features), jnp.float32, -mu_range, mu_range)
    bias_sigma = jnp.full((1, out_features),
                          sigma_init / math.sqrt(out_features), jnp.float32)

    eps_in = _scale_noise(k_ein, in_features)      # (in,)
    eps_out = _scale_noise(k_eout, out_features)   # (out,)

    # TODO(synk): PyTorch resamples eps via reset_noise() each step; here the
    # noise is frozen at init — the caller should regenerate eps_in/eps_out.
    return {
        "weight_mu": weight_mu,
        "weight_sigma": weight_sigma,
        "eps_in_row": eps_in[None, :],     # (1, in):  scales x columns
        "eps_out_row": eps_out[None, :],   # (1, out): scales sigma-matmul rows
        "bias_mu": bias_mu,
        "bias_sigma": bias_sigma,
        "bias_epsilon": eps_out[None, :],  # (1, out)
    }


# ------------------------------- reference ---------------------------------

def noisy_linear_ref(x, p, training=True):
    if training:
        w_eps = p["eps_out_row"].T * p["eps_in_row"]          # (out, in) outer product
        w = p["weight_mu"] + p["weight_sigma"] * w_eps
        b = p["bias_mu"] + p["bias_sigma"] * p["bias_epsilon"]
    else:
        w, b = p["weight_mu"], p["bias_mu"]
    return x @ w.T + b


# ---------------------------------- main ------------------------------------

if __name__ == "__main__":
    key = jax.random.PRNGKey(0)
    k_param, k_x = jax.random.split(key)

    batch, in_features, out_features = 8, 256, 256
    params = init_noisy_linear(k_param, in_features, out_features, sigma_init=0.5)
    x = jax.random.normal(k_x, (batch, in_features), dtype=jnp.float32)

    # Small tiles so the (out-tiles, K-tiles) grid / resident-output accumulation
    # path is exercised (grid = (2, 2)).
    tn, tk = 128, 128

    # training-mode forward (noisy weights) — the fused two-matmul path
    y_train = noisy_linear(x, params, training=True, tn=tn, tk=tk)
    y_train = jax.block_until_ready(y_train)
    ref_train = noisy_linear_ref(x, params, training=True)
    assert jnp.allclose(y_train, ref_train, atol=1e-3, rtol=1e-3), "train mismatch"

    # eval-mode forward (mean weights), same tiled/pipelined structure
    y_eval = noisy_linear(x, params, training=False, tn=tn, tk=tk)
    y_eval = jax.block_until_ready(y_eval)
    ref_eval = noisy_linear_ref(x, params, training=False)
    assert jnp.allclose(y_eval, ref_eval, atol=1e-3, rtol=1e-3), "eval mismatch"

    print("KERNEL_OK")
</pallas_src>

<mosaic_0001>
module attributes {stable_mosaic.version = 11 : i64} {
  func.func @_noisy_linear_train_kernel(%arg0: i32, %arg1: i32, %arg2: memref<8x128xf32, #tpu.memory_space<vmem>>, %arg3: memref<128x128xf32, #tpu.memory_space<vmem>>, %arg4: memref<128x128xf32, #tpu.memory_space<vmem>>, %arg5: memref<1x128xf32, #tpu.memory_space<vmem>>, %arg6: memref<1x128xf32, #tpu.memory_space<vmem>>, %arg7: memref<1x128xf32, #tpu.memory_space<vmem>>, %arg8: memref<8x128xf32, #tpu.memory_space<vmem>>) attributes {dimension_semantics = [#tpu.dimension_semantics<parallel>, #tpu.dimension_semantics<arbitrary>], iteration_bounds = array<i64: 2, 2>, scalar_prefetch = 0 : i64, scratch_operands = 0 : i64, tpu.core_type = #tpu.core_type<tc>, window_params = [{transform_indices = @transform_0, window_bounds = array<i64: 8, 128>}, {transform_indices = @transform_1, window_bounds = array<i64: 128, 128>}, {transform_indices = @transform_2, window_bounds = array<i64: 128, 128>}, {transform_indices = @transform_3, window_bounds = array<i64: 1, 128>}, {transform_indices = @transform_4, window_bounds = array<i64: 1, 128>}, {transform_indices = @transform_5, window_bounds = array<i64: 1, 128>}, {transform_indices = @transform_6, window_bounds = array<i64: 8, 128>}]} {
    %c0_i32 = arith.constant 0 : i32
    %0 = arith.cmpi eq, %arg1, %c0_i32 : i32
    %1 = arith.extui %0 : i1 to i32
    %c0_i32_0 = arith.constant 0 : i32
    %2 = arith.cmpi ne, %1, %c0_i32_0 : i32
    scf.if %2 {
      %cst_16 = arith.constant 0.000000e+00 : f32
      %21 = vector.broadcast %cst_16 : f32 to vector<8x128xf32>
      %c0_17 = arith.constant 0 : index
      %c0_18 = arith.constant 0 : index
      %22 = vector.load %arg8[%c0_17, %c0_18] : memref<8x128xf32, #tpu.memory_space<vmem>>, vector<8x128xf32>
      tpu.vector_store %arg8[%c0_17, %c0_18], %21 {strides = array<i32>} : memref<8x128xf32, #tpu.memory_space<vmem>>, vector<8x128xf32>,
    } else {
    }
    %c0 = arith.constant 0 : index
    %c0_1 = arith.constant 0 : index
    %3 = vector.load %arg2[%c0, %c0_1] : memref<8x128xf32, #tpu.memory_space<vmem>>, vector<8x128xf32>
    %c0_2 = arith.constant 0 : index
    %c0_3 = arith.constant 0 : index
    %4 = vector.load %arg5[%c0_2, %c0_3] : memref<1x128xf32, #tpu.memory_space<vmem>>, vector<1x128xf32>
    %5 = vector.broadcast %4 : vector<1x128xf32> to vector<8x128xf32>
    %6 = arith.mulf %3, %5 : vector<8x128xf32>
    %c0_4 = arith.constant 0 : index
    %c0_5 = arith.constant 0 : index
    %7 = vector.load %arg3[%c0_4, %c0_5] : memref<128x128xf32, #tpu.memory_space<vmem>>, vector<128x128xf32>
    %cst = arith.constant dense<0.000000e+00> : vector<8x128xf32>
    %8 = tpu.matmul %3, %7, %cst {dimension_numbers = #tpu.dot_dimension_numbers<[1], [1], [0], [0], [0, 0, 1, 0], [], []>} : vector<8x128xf32>, vector<128x128xf32>, vector<8x128xf32> -> vector<8x128xf32>
    %c0_6 = arith.constant 0 : index
    %c0_7 = arith.constant 0 : index
    %9 = vector.load %arg4[%c0_6, %c0_7] : memref<128x128xf32, #tpu.memory_space<vmem>>, vector<128x128xf32>
    %cst_8 = arith.constant dense<0.000000e+00> : vector<8x128xf32>
    %10 = tpu.matmul %6, %9, %cst_8 {dimension_numbers = #tpu.dot_dimension_numbers<[1], [1], [0], [0], [0, 0, 1, 0], [], []>} : vector<8x128xf32>, vector<128x128xf32>, vector<8x128xf32> -> vector<8x128xf32>
    %c0_9 = arith.constant 0 : index
    %c0_10 = arith.constant 0 : index
    %11 = vector.load %arg8[%c0_9, %c0_10] : memref<8x128xf32, #tpu.memory_space<vmem>>, vector<8x128xf32>
    %c0_11 = arith.constant 0 : index
    %c0_12 = arith.constant 0 : index
    %12 = vector.load %arg6[%c0_11, %c0_12] : memref<1x128xf32, #tpu.memory_space<vmem>>, vector<1x128xf32>
    %13 = vector.broadcast %12 : vector<1x128xf32> to vector<8x128xf32>
    %14 = arith.mulf %13, %10 : vector<8x128xf32>
    %15 = arith.addf %8, %14 : vector<8x128xf32>
    %16 = arith.addf %11, %15 : vector<8x128xf32>
    %c0_13 = arith.constant 0 : index
    %c0_14 = arith.constant 0 : index
    %17 = vector.load %arg8[%c0_13, %c0_14] : memref<8x128xf32, #tpu.memory_space<vmem>>, vector<8x128xf32>
    tpu.vector_store %arg8[%c0_13, %c0_14], %16 {strides = array<i32>} : memref<8x128xf32, #tpu.memory_space<vmem>>, vector<8x128xf32>,
    %c1_i32 = arith.constant 1 : i32
    %18 = arith.cmpi eq, %arg1, %c1_i32 : i32
    %19 = arith.extui %18 : i1 to i32
    %c0_i32_15 = arith.constant 0 : i32
    %20 = arith.cmpi ne, %19, %c0_i32_15 : i32
    scf.if %20 {
      %c0_16 = arith.constant 0 : index
      %c0_17 = arith.constant 0 : index
      %21 = vector.load %arg8[%c0_16, %c0_17] : memref<8x128xf32, #tpu.memory_space<vmem>>, vector<8x128xf32>
      %c0_18 = arith.constant 0 : index
      %c0_19 = arith.constant 0 : index
      %22 = vector.load %arg7[%c0_18, %c0_19] : memref<1x128xf32, #tpu.memory_space<vmem>>, vector<1x128xf32>
      %23 = vector.broadcast %22 : vector<1x128xf32> to vector<8x128xf32>
      %24 = arith.addf %21, %23 : vector<8x128xf32>
      %c0_20 = arith.constant 0 : index
      %c0_21 = arith.constant 0 : index
      %25 = vector.load %arg8[%c0_20, %c0_21] : memref<8x128xf32, #tpu.memory_space<vmem>>, vector<8x128xf32>
      tpu.vector_store %arg8[%c0_20, %c0_21], %24 {strides = array<i32>} : memref<8x128xf32, #tpu.memory_space<vmem>>, vector<8x128xf32>,
    } else {
    }
    return
  }
  func.func @transform_0(%arg0: i32, %arg1: i32) -> (i32, i32) {
    %c0_i32 = arith.constant 0 : i32
    %c0_i32_0 = arith.constant 0 : i32
    return %c0_i32, %arg1 : i32, i32
  }
  func.func @transform_1(%arg0: i32, %arg1: i32) -> (i32, i32) {
    %c0_i32 = arith.constant 0 : i32
    return %arg0, %arg1 : i32, i32
  }
  func.func @transform_2(%arg0: i32, %arg1: i32) -> (i32, i32) {
    %c0_i32 = arith.constant 0 : i32
    return %arg0, %arg1 : i32, i32
  }
  func.func @transform_3(%arg0: i32, %arg1: i32) -> (i32, i32) {
    %c0_i32 = arith.constant 0 : i32
    %c0_i32_0 = arith.constant 0 : i32
    return %c0_i32, %arg1 : i32, i32
  }
  func.func @transform_4(%arg0: i32, %arg1: i32) -> (i32, i32) {
    %c0_i32 = arith.constant 0 : i32
    %c0_i32_0 = arith.constant 0 : i32
    return %c0_i32, %arg0 : i32, i32
  }
  func.func @transform_5(%arg0: i32, %arg1: i32) -> (i32, i32) {
    %c0_i32 = arith.constant 0 : i32
    %c0_i32_0 = arith.constant 0 : i32
    return %c0_i32, %arg0 : i32, i32
  }
  func.func @transform_6(%arg0: i32, %arg1: i32) -> (i32, i32) {
    %c0_i32 = arith.constant 0 : i32
    %c0_i32_0 = arith.constant 0 : i32
    return %c0_i32, %arg0 : i32, i32
  }
}

</mosaic_0001>

<bundles_post_ra>
// kernel: noisy_linear.1
= control target key start
LH: loop header
LB: loop body
LE: loop exit
PB: predicated region body
PF: predicated region fallthrough
CT: control target
= control target key end

     0   :  { %s1499_s0 = inlined_call_operand.hbm [shape: f32[8,256], index: 0, kind: input, shape index: {}]   ;;  %s1500_s1 = inlined_call_operand.hbm [shape: f32[256,256], index: 1, kind: input, shape index: {}]   ;;  %s1501_s2 = inlined_call_operand.hbm [shape: f32[256,256], index: 2, kind: input, shape index: {}]   ;;  %s1502_s3 = inlined_call_operand.vmem [shape: f32[1,256], index: 3, kind: input, shape index: {}]   ;;  %s1503_s4 = inlined_call_operand.vmem [shape: f32[1,256], index: 4, kind: input, shape index: {}]   ;;  %s1504_s5 = inlined_call_operand.vmem [shape: f32[1,256], index: 5, kind: input, shape index: {}]   ;;  %s1505_s6 = inlined_call_operand.hbm [shape: f32[8,256], index: 6, kind: output, shape index: {}]  }
   0x1   :  { %1520 = sst [smem:[#allocation23_spill]] %s1500_s1 }
   0x2   :  { %1521 = sst [smem:[#allocation24_spill]] %s1501_s2 }
   0x3   :  { %1522 = sst [smem:[#allocation25_spill]] %s1502_s3 }
   0x4   :  { %1523 = sst [smem:[#allocation26_spill]] %s1503_s4 }
   0x5   :  { %1524 = sst [smem:[#allocation27_spill]] %s1504_s5 }
   0x6   :  { %1525 = sst [smem:[#allocation28_spill]] %s1505_s6 }
   0x7   :  { %11 = vsyncpa [#allocation3], 0 }
   0x8   :  { %13 = vsyncpa [#allocation3 + $0x1], 0 }
   0x9   :  { %14 = vsyncpa [#allocation6], 0 }
   0xa   :  { %16 = vsyncpa [#allocation6 + $0x1], 0 }
   0xb   :  { %17 = vsyncpa [#allocation4], 0 }
   0xc   :  { %19 = vsyncpa [#allocation4 + $0x1], 0  ;;  %s1138_s21 = smov 0   ;;  %s1140_s22 = smov 0  }
   0xd   :  { %s1142_s23 = smov 0   ;;  %s1144_s24 = smov 0  }
   0xe   :  { %s1146_s25 = smov 0   ;;  %s1148_s26 = smov 0  }
   0xf   :  { %s1150_s27 = smov 0   ;;  %s1152_s28 = smov 0  }
  0x10   :  { %s1154_s29 = smov 0   ;;  %s1156_s30 = smov 0  }
  0x11   :  { %s1158_s7 = smov 0   ;;  %s1160_s8 = smov 0  }
  0x12   :  { %s1162_s9 = smov 0   ;;  %s1164_s10 = smov 0  }
  0x13 LB: > { %1526 = sst [smem:[#allocation12_spill]] %s1053_s23  ;;  %p52_p0 = scmp.eq.s32.totalorder %s1097_s10, 0  ;;  %s1097_s10 = sphi %s1164_s10, %s25_s10   ;;  %s1093_s9 = sphi %s1162_s9, %s1572_s9   ;;  %s1089_s8 = sphi %s1160_s8, %s1580_s8   ;;  %s1085_s7 = sphi %s1158_s7, %s1570_s7   ;;  %s1081_s30 = sphi %s1156_s30, %s1579_s30   ;;  %s1077_s29 = sphi %s1154_s29, %s1569_s29   ;;  %s1073_s28 = sphi %s1152_s28, %s1578_s28   ;;  %s1069_s27 = sphi %s1150_s27, %s1577_s27   ;;  %s1065_s26 = sphi %s1148_s26, %s1567_s26   ;;  %s1061_s25 = sphi %s1146_s25, %s1576_s25   ;;  %s1057_s24 = sphi %s1144_s24, %s1575_s24   ;;  %s1053_s23 = sphi %s1142_s23, %s1565_s23   ;;  %s1049_s22 = sphi %s1140_s22, %s1574_s22   ;;  %s1045_s21 = sphi %s1138_s21, %s1573_s21  }
  0x14   : > { %1527 = sst [smem:[#allocation13_spill]] %s1065_s26  ;;  %p79_p1 = scmp.ne.s32.totalorder %s1065_s26, %s1061_s25 }
  0x15   : > { %1528 = sst [smem:[#allocation14_spill]] %s1077_s29  ;;  %p1513_p2 = scmp.lt.s32.totalorder %s1097_s10, 4 }
  0x16   : > { %1529 = sst [smem:[#allocation15_spill]] %s1085_s7  ;;  %p81_p3 = por %p79_p1, %p52_p0 }
  0x17   : > { %1530 = sst [smem:[#allocation16_spill]] %s1093_s9  ;;  %s260_s12 = sand.u32 1, %s1097_s10  }
  0x18   : > { %s262_s13 = sand.u32 1, %s1065_s26   ;;  %s712_s15 = sshll.u32 %s1093_s9, 5 }
  0x19   : > { %s693_s14 = sshll.u32 %s262_s13, 7  ;;  %s269_s16 = sadd.s32 %s1089_s8, %s712_s15 }
  0x1a   : > { %s696_s17 = sshll.u32 %s269_s16, 3  ;;  %s264_s18 = scalar_lea.vmem [#allocation5], %s693_s14 }
  0x1b   : > { %s274_s19 = sshll.u32 %s264_s18, 4  ;;  %s1531_s1 = sld [smem:[#allocation23_spill]]  ;;  %s275_s19 = int_to_ptr.vmem [resolvable:$true] %s274_s19 }
  0x1c   : > { %p1224_p4 = pnand %p1513_p2, %p81_p3  ;;  %s1228_s13 = scalar_lea.sflag [#allocation6], %s260_s12 }
  0x1d   : > { %s1508_s15 = smov 256   ;;  %s1509_s6 = smov 128  }
  0x1e   : > { %s1510_s16 = smov 8   ;;  %s1533_s2 = sld [smem:[#allocation24_spill]] }
  0x1f   : > { %s288_s12 = scalar_lea.vmem [#allocation7], %s693_s14  ;;  %s72_s3 = sadd.s32 1, %s1065_s26 }
  0x20   : > { %p701_p5 = scmp.ge.s32.totalorder %s1097_s10, 1  ;;  %p324_p6 = scmp.lt.s32.totalorder %s1097_s10, 5 }
  0x21   : > { %s271_s5 = scalar_lea.hbm %s1531_s1, %s696_s17  ;;  %s1239_s1 = sshll.u32 %s288_s12, 4 }
  0x22   : > { %s272_s11 = sshll.u32 %s271_s5, 4  ;;  %1534 = sst [smem:[#allocation17_spill]] %s1239_s1  ;;  %s273_s11 = int_to_ptr.hbm [resolvable:$true] %s272_s11 }
  0x23   : > { %728 = dma.hbm_to_vmem [thread:$0]  (!%p1224_p4), %s273_s11, 2048, %s275_s19, %s1228_s13, %s1508_s15, %s1509_s6, %s1510_s16  }
  0x24   : > { %s295_s20 = scalar_lea.hbm %s1533_s2, %s696_s17  ;;  %p1247_p7 = pnand %p701_p5, %p324_p6 }
  0x25   : > { %s296_s7 = sshll.u32 %s295_s20, 4  ;;  %s1252_s14 = sadd.s32 4294967295, %s1097_s10   ;;  %s1244_s7 = int_to_ptr.hbm [resolvable:$true] %s296_s7 }
  0x26   : > { %s688_s17 = sadd.s32 4294967294, %s1097_s10   ;;  %s34_s19 = sadd.s32 1, %s1089_s8 }
  0x27   : > { %p35_p8 = scmp.ge.s32.totalorder %s34_s19, 2  ;;  %s44_s5 = sadd.s32 1, %s1077_s29 }
  0x28   : > { %p57_p9 = scmp.ne.s32.totalorder %s1073_s28, %s1069_s27  ;;  %p58_p10 = scmp.eq.s32.totalorder %s1252_s14, 0 }
  0x29   : > { %s1582_s19 = smov (%p35_p8, %s34_s19), 0  ;;  %s1537_s18 = sadd.s32 1, %s1093_s9 }
  0x2a   : > { %1536 = sst [smem:[#allocation18_spill]] %s1582_s19  ;;  %s1584_s18 = smov (!%p35_p8, %s1537_s18), %s1093_s9 }
  0x2b   : > { %s41_s20 = ssub.s32 %s1089_s8, %s1582_s19  ;;  %p51_p11 = scmp.ne.s32.totalorder %s1077_s29, %s1073_s28 }
  0x2c   : > { %p39_p12 = scmp.ge.s32.totalorder %s1584_s18, 2  ;;  %p42_p13 = scmp.eq.s32.totalorder %s41_s20, 0 }
  0x2d   : > { %p1269_p1 = por %p58_p10, %p57_p9  ;;  %p85_p3 = scmp.ne.s32.totalorder %s1061_s25, %s1057_s24 }
  0x2e   : > { %s1586_s18 = smov (%p39_p12, %s1584_s18), 0  ;;  %s204_s1 = sadd.s32 1, %s1053_s23 }
  0x2f   : > { %1539 = sst [smem:[#allocation19_spill]] %s1586_s18  ;;  %s67_s15 = ssub.s32 %s1093_s9, %s1586_s18 }
  0x30   : > { %s1278_s12 = scalar_select %p42_p13, %s1077_s29, %s44_s5  }
  0x31   : > { %p1282_p5 = por %p85_p3, %p58_p10  ;;  %s69_s16 = sor.u32 %s67_s15, %s41_s20 }
  0x32   : > { %1540 = sst [smem:[#allocation20_spill]] %s1278_s12  ;;  %p202_p6 = scmp.eq.s32.totalorder %s67_s15, 0 }
  0x33   : > { %p70_p8 = scmp.eq.s32.totalorder %s69_s16, 0  ;;  %p214_p9 = scmp.ne.s32.totalorder %s1053_s23, %s1049_s22 }
  0x34   : > { %s1288_s24 = scalar_select %p202_p6, %s1053_s23, %s204_s1  }
  0x35   : > { %s1293_s2 = scalar_select %p70_p8, %s1065_s26, %s72_s3  }
  0x36   : > { %1542 = sst [smem:[#allocation21_spill]] %s1288_s24  ;;  %p215_p12 = scmp.eq.s32.totalorder %s1252_s14, 3 }
  0x37   : > { %1543 = sst [smem:[#allocation22_spill]] %s1293_s2  ;;  %p220_p10 = scmp.ne.s32.totalorder %s1049_s22, %s1045_s21 }
  0x38   : > { %s1544_s5 = sld [smem:[#allocation17_spill]]  ;;  %p221_p13 = scmp.eq.s32.totalorder %s688_s17, 3 }
  0x39   : > { %p1300_p3 = por %p215_p12, %p214_p9  ;;  %s241_s15 = sand.u32 1, %s1077_s29  }
  0x3a   : > { %p53_p6 = por %p52_p0, %p51_p11  ;;  %p1310_p2 = por %p221_p13, %p220_p10 }
  0x3b   : > { %s691_s3 = sshll.u32 %s241_s15, 3  ;;  %s692_s16 = sshll.u32 %s1089_s8, 3 }
  0x3c   : > { %s1546_s1 = scalar_select %p1310_p2, 1, 0 }
  0x3d   : > { %s249_s9 = scalar_lea.hbm %s1499_s0, %s692_s16  ;;  %s245_s17 = scalar_lea.vmem [#allocation2], %s691_s3 }
  0x3e   : > { %1547 = sst [smem:[#allocation17_spill]] %s1546_s1  ;;  %s251_s12 = sshll.u32 %s249_s9, 4  ;;  %s252_s12 = int_to_ptr.hbm [resolvable:$true] %s251_s12 }
  0x3f   : > { %s253_s2 = sshll.u32 %s245_s17, 4  ;;  %p1548_p8 = scmp.lt.s32.totalorder %s1097_s10, 4  ;;  %s254_s2 = int_to_ptr.vmem [resolvable:$true] %s253_s2 }
  0x40   : > { %s1549_s29 = smov 8   ;;  %s1550_s26 = smov 128  }
  0x41   : > { %p723_p9 = pnand %p1548_p8, %p53_p6  ;;  %s1551_s24 = smov 256  }
  0x42   : > { %s1552_s23 = int_to_ptr.vmem [resolvable:$true] %s1544_s5  ;;  %s242_s1 = scalar_lea.sflag [#allocation3], %s241_s15 }
  0x43   : > { %731 = dma.hbm_to_vmem [thread:$0]  (!%p1224_p4), %s1244_s7, 2048, %s1552_s23, %s1228_s13, %s1551_s24, %s1550_s26, %s1549_s29  }
  0x44   : > { %725 = dma.hbm_to_vmem [thread:$0]  (!%p723_p9), %s252_s12, 128, %s254_s2, %s242_s1  }
  0x45   : > { %328 = sbr.rel (%p1247_p7) target bundleno = 321 (0x141), region = 44  ;;  %s330_s9 = sand.u32 (!%p1247_p7), 1, %s1073_s28  }
  0x46   : > { %s1332_s19 = sshll.u32 (!%p1247_p7), %s330_s9, 3  ;;  %s331_s3 = scalar_lea.sflag (!%p1247_p7), [#allocation3], %s330_s9 }
  0x47   : > { %s334_s16 = scalar_lea.vmem (!%p1247_p7), [#allocation2], %s1332_s19 }
  0x4a   : > { %1032 = dma.done.wait (%p1269_p1), %s331_s3, 128  }
  0x4b   : > { %1034 = vsyncadd (%p1269_p1), %s331_s3, 4294967168  ;;  %s340_s2 = sand.u32 1, %s1252_s14   ;;  %s342_s4 = sand.u32 1, %s1061_s25  }
  0x4c   : > { %s703_s23 = sshll.u32 %s342_s4, 7  ;;  %s341_s26 = scalar_lea.sflag [#allocation6], %s340_s2 }
  0x4d   : > { %s1341_s29 = scalar_lea.vmem [#allocation5], %s703_s23 }
  0x4e   : > { %1036 = dma.done.wait (%p1282_p5), %s341_s26, 4096  }
  0x4f   : > { %1038 = vsyncadd (%p1282_p5), %s341_s26, 4294963200  ;;  %s1553_s7 = sld [smem:[#allocation15_spill]]  ;;  %s400_s13 = sand.u32 1, %s1049_s22  }
  0x50   : > { %s705_s11 = sshll.u32 %s400_s13, 3  ;;  %p405_p0 = scmp.lt.s32.totalorder %s1081_s30, 1 }
  0x51   : > { %s1554_s6 = sld [smem:[#allocation25_spill]]  ;;  %s1370_s4 = scalar_lea.vmem [#allocation7], %s703_s23 }
  0x52   : > { %s1353_s14 = scalar_select %p405_p0, %s1081_s30, 1 }
  0x53   : > { %s1555_s1 = sld [smem:[#allocation26_spill]]  ;;  %s1372_s26 = scalar_lea.vmem [#allocation8], %s705_s11 }
  0x54   : > { %s1556_s3 = sld [smem:[#allocation27_spill]]  ;;  %p706_p7 = scmp.ne.s32.totalorder %s1081_s30, 0 }
  0x55   : > { %p408_p4 = scmp.lt.s32.totalorder %s1553_s7, 1 }
  0x56   : > { %417 = sbr.rel (%p706_p7) target bundleno = 93 (0x5d), region = 60 }
  0x57   : > { %s1588_s7 = smov (!%p408_p4, %s1553_s7), 1  ;;  %s407_s24 = scalar_lea.vmem %s1554_s6, %s1353_s14 }
  0x59   : > { %s410_s20 = scalar_lea.vmem %s1555_s1, %s1588_s7 }
  0x5a   : > { %s413_s2 = scalar_lea.vmem %s1556_s3, %s1588_s7 }
  0x5b   : > { %v1102_v0 = vmov 0.0  }
  0x5c   : > { %418 = vst [vmem:[%s1372_s26] sm:$0xff] %v1102_v0 }
  0x5d PF: > { %v456_v1 = vld [vmem:[%s1370_s4 + $0x78] sm:$0xff]  ;;  %v455_v3 = vld [vmem:[%s1370_s4 + $0x70] sm:$0xff]  ;;  %v454_v5 = vld [vmem:[%s1370_s4 + $0x68] sm:$0xff]  ;;  %p707_p11 = scmp.ne.s32.totalorder %s1081_s30, 1 }
  0x5e   : > { %v440_v2 = vld [vmem:[%s1341_s29 + $0x78] sm:$0xff]  ;;  %457 = vmatpush.xpose.msra.mxu0 %v456_v1  ;;  %v439_v4 = vld [vmem:[%s1341_s29 + $0x70] sm:$0xff]  ;;  %v438_v6 = vld [vmem:[%s1341_s29 + $0x68] sm:$0xff] }
  0x5f   : > { %483 = vmatpush.xpose.msra.mxu1 %v440_v2  ;;  %v453_v7 = vld [vmem:[%s1370_s4 + $0x60] sm:$0xff]  ;;  %v452_v9 = vld [vmem:[%s1370_s4 + $0x58] sm:$0xff]  ;;  %v451_v11 = vld [vmem:[%s1370_s4 + $0x50] sm:$0xff] }
  0x60   : > { %v437_v8 = vld [vmem:[%s1341_s29 + $0x60] sm:$0xff]  ;;  %v436_v10 = vld [vmem:[%s1341_s29 + $0x58] sm:$0xff]  ;;  %v435_v12 = vld [vmem:[%s1341_s29 + $0x50] sm:$0xff] }
  0x61   : > { %v450_v13 = vld [vmem:[%s1370_s4 + $0x48] sm:$0xff]  ;;  %v449_v15 = vld [vmem:[%s1370_s4 + $0x40] sm:$0xff]  ;;  %v448_v17 = vld [vmem:[%s1370_s4 + $0x38] sm:$0xff] }
  0x62   : > { %458 = vmatpush.xpose.msra.mxu0 %v455_v3  ;;  %v434_v14 = vld [vmem:[%s1341_s29 + $0x48] sm:$0xff]  ;;  %v433_v16 = vld [vmem:[%s1341_s29 + $0x40] sm:$0xff]  ;;  %v432_v18 = vld [vmem:[%s1341_s29 + $0x38] sm:$0xff] }
  0x63   : > { %484 = vmatpush.xpose.msra.mxu1 %v439_v4  ;;  %v447_v19 = vld [vmem:[%s1370_s4 + $0x30] sm:$0xff]  ;;  %v446_v21 = vld [vmem:[%s1370_s4 + $0x28] sm:$0xff]  ;;  %v445_v23 = vld [vmem:[%s1370_s4 + $0x20] sm:$0xff] }
  0x64   : > { %v431_v20 = vld [vmem:[%s1341_s29 + $0x30] sm:$0xff]  ;;  %v430_v22 = vld [vmem:[%s1341_s29 + $0x28] sm:$0xff]  ;;  %v429_v24 = vld [vmem:[%s1341_s29 + $0x20] sm:$0xff] }
  0x65   : > { %v444_v25 = vld [vmem:[%s1370_s4 + $0x18] sm:$0xff]  ;;  %v443_v27 = vld [vmem:[%s1370_s4 + $0x10] sm:$0xff]  ;;  %v442_v29 = vld [vmem:[%s1370_s4 + $0x8] sm:$0xff] }
  0x66   : > { %459 = vmatpush.xpose.msra.mxu0 %v454_v5  ;;  %v428_v26 = vld [vmem:[%s1341_s29 + $0x18] sm:$0xff]  ;;  %v427_v28 = vld [vmem:[%s1341_s29 + $0x10] sm:$0xff]  ;;  %v426_v30 = vld [vmem:[%s1341_s29 + $0x8] sm:$0xff] }
  0x67   : > { %485 = vmatpush.xpose.msra.mxu1 %v438_v6  ;;  %v854_v31 = vld [vmem:[%s407_s24] ss:$0 sm:$0xff]  ;;  %v441_v33 = vld [vmem:[%s1370_s4] sm:$0xff] }
  0x68   : > { %v419_v32 = vld [vmem:[%s334_s16] sm:$0xff]  ;;  %v425_v34 = vld [vmem:[%s1341_s29] sm:$0xff] }
  0x69   : > { %v424_v35 = vmul.f32 %v854_v31, %v419_v32  ;;  %v855_v36 = vld [vmem:[%s410_s20] ss:$0 sm:$0xff]  ;;  %v477_v40 = vld [vmem:[%s1372_s26] sm:$0xff] }
  0x6a   : > { %460 = vmatpush.xpose.msra.mxu0 %v453_v7 }
  0x6b   : > { %486 = vmatpush.xpose.msra.mxu1 %v437_v8 }
  0x6e   : > { %461 = vmatpush.xpose.msra.mxu0 %v452_v9 }
  0x6f   : > { %487 = vmatpush.xpose.msra.mxu1 %v436_v10 }
  0x72   : > { %462 = vmatpush.xpose.msra.mxu0 %v451_v11 }
  0x73   : > { %488 = vmatpush.xpose.msra.mxu1 %v435_v12 }
  0x76   : > { %463 = vmatpush.xpose.msra.mxu0 %v450_v13 }
  0x77   : > { %489 = vmatpush.xpose.msra.mxu1 %v434_v14 }
  0x7a   : > { %464 = vmatpush.xpose.msra.mxu0 %v449_v15 }
  0x7b   : > { %490 = vmatpush.xpose.msra.mxu1 %v433_v16 }
  0x7e   : > { %465 = vmatpush.xpose.msra.mxu0 %v448_v17 }
  0x7f   : > { %491 = vmatpush.xpose.msra.mxu1 %v432_v18 }
  0x82   : > { %466 = vmatpush.xpose.msra.mxu0 %v447_v19 }
  0x83   : > { %492 = vmatpush.xpose.msra.mxu1 %v431_v20 }
  0x86   : > { %467 = vmatpush.xpose.msra.mxu0 %v446_v21 }
  0x87   : > { %493 = vmatpush.xpose.msra.mxu1 %v430_v22 }
  0x8a   : > { %468 = vmatpush.xpose.msra.mxu0 %v445_v23 }
  0x8b   : > { %494 = vmatpush.xpose.msra.mxu1 %v429_v24 }
  0x8e   : > { %469 = vmatpush.xpose.msra.mxu0 %v444_v25 }
  0x8f   : > { %495 = vmatpush.xpose.msra.mxu1 %v428_v26 }
  0x92   : > { %470 = vmatpush.xpose.msra.mxu0 %v443_v27 }
  0x93   : > { %496 = vmatpush.xpose.msra.mxu1 %v427_v28 }
  0x96   : > { %471 = vmatpush.xpose.msra.mxu0 %v442_v29 }
  0x97   : > { %497 = vmatpush.xpose.msra.mxu1 %v426_v30 }
  0x9a   : > { %472 = vmatpush.xpose.msra.mxu0 %v441_v33 }
  0x9b   : > { %498 = vmatpush.xpose.msra.mxu1 %v425_v34 }
  0x9d   : > { %473 = vmatmul.f32.vlgmr.msra.gmra.mxu0 %v424_v35 }
  0x9e   : > { %499 = vmatmul.f32.vlgmr.msra.gmra.mxu1 %v419_v32 }
 0x11a   : > { %v474_v37 = vpop.f32.mrf.mxu0 }
 0x11b   : > { %v500_v38 = vpop.f32.mrf.mxu1  ;;  %v482_v39 = vmul.f32 %v855_v36, %v474_v37 }
 0x11d   : > { %v501_v41 = vadd.f32 %v500_v38, %v482_v39  ;;  %508 = sbr.rel (%p707_p11) target bundleno = 300 (0x12c), region = 64 }
 0x11f   : > { %v503_v42 = vadd.f32 %v501_v41, %v477_v40 }
 0x121   : > { %504 = vst [vmem:[%s1372_s26] sm:$0xff] %v503_v42 }
 0x122   : > { %v856_v44 = vld [vmem:[%s413_s2] ss:$0 sm:$0xff] }
 0x128   : > { %v509_v43 = vld [vmem:[%s1372_s26] sm:$0xff] }
 0x129   : > { %v514_v45 = vadd.f32 %v856_v44, %v509_v43 }
 0x12b   : > { %515 = vst [vmem:[%s1372_s26] sm:$0xff] %v514_v45 }
 0x12c PF: > { %s1560_s14 = sld [smem:[#allocation15_spill]]  ;;  %s529_s17 = sshll.u32 %s1372_s26, 4  ;;  %s530_s17 = int_to_ptr.vmem [resolvable:$true] %s529_s17 }
 0x12d   : > { %s1561_s1 = sld [smem:[#allocation28_spill]]  ;;  %s517_s3 = scalar_lea.sflag [#allocation4], %s400_s13 }
 0x132   : > { %s709_s24 = sshll.u32 %s1560_s14, 3 }
 0x133   : > { %s527_s20 = scalar_lea.hbm %s1561_s1, %s709_s24  ;;  %s967_s11 = scalar_lea.hbm %s1561_s1, 16 }
 0x134   : > { %s531_s9 = sshll.u32 %s527_s20, 4  ;;  %s532_s9 = int_to_ptr.hbm [resolvable:$true] %s531_s9 }
 0x135   : > { %s961_s7 = sshra.s32 %s532_s9, 4  ;;  %s962_s7 = int_to_ptr.hbm [resolvable:$true] %s961_s7 }
 0x136   : > { %s963_s2 = scalar_lea.hbm %s962_s7, 8  ;;  %p968_p10 = scmp.lt.s32.totalorder %s962_s7, %s1561_s1 }
 0x137   : > { %p964_p1 = scmp.ne.s32.totalorder %s962_s7, %s963_s2  ;;  %p969_p13 = scmp.lt.s32.totalorder %s967_s11, %s963_s2 }
 0x139   : > { %p965_p5 = pnand %p964_p1, %p1300_p3  ;;  %p970_p6 = por %p969_p13, %p968_p10 }
 0x13b   : > { %p966_p12 = pneg %p965_p5 }
 0x13d   : > { %p971_p8 = pnand %p970_p6, %p966_p12 }
 0x13f   : > { %974 = shalt.err (!%p971_p8)
}
 0x140   : > { %720 = dma.vmem_to_hbm [thread:$0]  (%p1300_p3), %s530_s17, 128, %s532_s9, %s517_s3  }
 0x141 PF: > { %p737_p9 = scmp.ge.s32.totalorder %s1097_s10, 2  ;;  %s543_s26 = sand.u32 1, %s1045_s21  }
 0x142   : > { %s544_s6 = scalar_lea.sflag [#allocation4], %s543_s26 }
 0x143   : > { %p733_p0 = pnand %p737_p9, %p1310_p2 }
 0x145   : > { %p734_p4 = pneg %p733_p0 }
 0x147   : > { %1040 = dma.done.wait (%p734_p4), %s544_s6, 128  }
 0x148   : > { %1042 = vsyncadd (%p734_p4), %s544_s6, 4294967168  ;;  %s25_s10 = sadd.s32 1, %s1097_s10   ;;  %s1564_s18 = sld [smem:[#allocation12_spill]] }
 0x149   : > { %p1452_p7 = scmp.ge.s32.totalorder %s25_s10, 6   ;;  %s1565_s23 = sld [smem:[#allocation21_spill]] }
 0x14a   : > { %s1566_s19 = sld [smem:[#allocation13_spill]]  ;;  %s1573_s21 = smov %s1049_s22 }
 0x14b   : > { %s1567_s26 = sld [smem:[#allocation22_spill]]  ;;  %s1575_s24 = smov %s1061_s25 }
 0x14c   : > { %s1568_s16 = sld [smem:[#allocation14_spill]]  ;;  %s1577_s27 = smov %s1073_s28 }
 0x14d   : > { %s1569_s29 = sld [smem:[#allocation20_spill]]  ;;  %s1579_s30 = smov %s1089_s8 }
 0x14e   : > { %s1570_s7 = sld [smem:[#allocation16_spill]]  ;;  %s1574_s22 = smov %s1564_s18 }
 0x14f   : > { %s1571_s14 = sld [smem:[#allocation18_spill]] }
 0x150   : > { %s1572_s9 = sld [smem:[#allocation19_spill]]  ;;  %s1576_s25 = smov %s1566_s19 }
 0x151   :  { %24 = sbr.rel (!%p1452_p7) target bundleno = 19 (0x13), region = 130 }
 0x152   : > { %s1578_s28 = smov %s1568_s16 }
 0x155   : > { %s1580_s8 = smov %s1571_s14 }
 0x156   :  { %550 = vsyncpa [#allocation3], 1 }
 0x157   :  { %552 = vsyncpa [#allocation3 + $0x1], 1 }
 0x158   :  { %553 = vsyncpa [#allocation6], 1 }
 0x159   :  { %555 = vsyncpa [#allocation6 + $0x1], 1 }
 0x15a   :  { %556 = vsyncpa [#allocation4], 1 }
 0x15b   :  { %558 = vsyncpa [#allocation4 + $0x1], 1 }

</bundles_post_ra>
